<compile_context>
chip_gen: v6e
topology: v6e:2x2x1
jax: 0.10.0
libtpu: 0.0.40
codegen_flags: <defaults>
</compile_context>

<pallas_src>
import functools

import jax
import jax.numpy as jnp
from jax.experimental import pallas as pl
from jax.experimental.pallas import tpu as pltpu

IMAGE_SIZE = 784
LAYER_DIMS = [(784, 128), (128, 64), (64, 10), (10, 10), (10, 10), (10, 10)]
DEFAULT_TILE_B = 2048  # multiple of 8; 2 bufs x 2048 x 784 x 2B (bf16) ~= 6.4 MiB


def _round_up(n, m):
    return ((n + m - 1) // m) * m


def _mlp_logsoftmax_kernel(x_ref,
                           w0_ref, b0_ref, w1_ref, b1_ref, w2_ref, b2_ref,
                           w3_ref, b3_ref, w4_ref, b4_ref, w5_ref, b5_ref,
                           o_ref):
    # fc0: bf16 x bf16 on the MXU, f32 accumulate; everything after stays f32.
    h = jnp.dot(x_ref[...], w0_ref[...], preferred_element_type=jnp.float32)
    h = jnp.maximum(h + b0_ref[...], 0.0)

    # fc1..fc5 in f32 (tiny FLOPs, weights VMEM-resident), ReLU after each —
    # exactly as in Model_E.forward.
    # TODO(synk): if v7x profiling ever shows MXU weight-swap latency of the
    # 10-wide layers binding, move them to VPU broadcast-FMA; hidden under DMA
    # on v5e/v6e.
    for w_ref, b_ref in ((w1_ref, b1_ref), (w2_ref, b2_ref),
                         (w3_ref, b3_ref), (w4_ref, b4_ref), (w5_ref, b5_ref)):
        h = jnp.dot(h, w_ref[...], preferred_element_type=jnp.float32) + b_ref[...]
        h = jnp.maximum(h, 0.0)

    # log_softmax over dim=1 (numerically stable, f32).
    m = jnp.max(h, axis=-1, keepdims=True)
    s = h - m
    lse = jnp.log(jnp.sum(jnp.exp(s), axis=-1, keepdims=True))
    o_ref[...] = s - lse


@functools.partial(jax.jit, static_argnames=("tile_b",))
def model_e_forward(x, params, tile_b=DEFAULT_TILE_B):
    """x: any shape whose elements flatten to (-1, 784), like torch x.view(-1, 784)."""
    x2d = jnp.reshape(x, (-1, IMAGE_SIZE)).astype(jnp.bfloat16)
    B = x2d.shape[0]

    # Batch tile: multiple of 8 (BlockSpec sublane constraint), capped at tile_b,
    # and capped so the grid has >=2 steps when B allows (both v7x TCs get work).
    tile_b = _round_up(max(int(tile_b), 8), 8)
    tb = min(tile_b, _round_up(B, 8))
    if B >= 16:
        tb = min(tb, _round_up(pl.cdiv(_round_up(B, 8), 2), 8))
    Bp = _round_up(B, tb)
    if Bp != B:
        x2d = jnp.pad(x2d, ((0, Bp - B), (0, 0)))

    # Params: w0 in bf16 for the MXU fc0 pass; everything else stays f32.
    kernel_params = []
    for i in range(len(LAYER_DIMS)):
        w, b = params[2 * i], params[2 * i + 1]
        if i == 0:
            w = w.astype(jnp.bfloat16)
        kernel_params.extend([w, b.astype(jnp.float32)])

    # x / output stream through the grid; params stay resident (constant index_map).
    x_spec = pl.BlockSpec((tb, IMAGE_SIZE), lambda i: (i, 0))
    out_spec = pl.BlockSpec((tb, 10), lambda i: (i, 0))
    param_specs = [pl.BlockSpec(p.shape, lambda i: (0, 0)) for p in kernel_params]

    # Generation-aware VMEM budget: the double-buffered bf16 x stream dominates.
    param_bytes = sum(int(p.size) * p.dtype.itemsize for p in kernel_params)
    vmem_bytes = (2 * tb * IMAGE_SIZE * 2            # x stream (bf16, 2 bufs)
                  + 2 * tb * 10 * 4                  # out stream (f32, 2 bufs)
                  + 2 * param_bytes                  # resident params (worst case 2 bufs)
                  + tb * (128 + 64 + 4 * 10) * 4     # f32 intermediates
                  + (8 << 20))                       # scratch / regalloc slack
    vmem_bytes = int(min(vmem_bytes, 64 << 20))      # never exceed v7x physical VMEM

    flops = 2 * Bp * sum(fi * fo for fi, fo in LAYER_DIMS)
    cost = pl.CostEstimate(
        flops=flops,
        transcendentals=Bp * 11,                     # 10 exp + 1 log per row
        bytes_accessed=Bp * IMAGE_SIZE * 2 + Bp * 10 * 4 + param_bytes)

    out = pl.pallas_call(
        _mlp_logsoftmax_kernel,
        out_shape=jax.ShapeDtypeStruct((Bp, 10), jnp.float32),
        grid=(Bp // tb,),
        in_specs=[x_spec] + param_specs,
        out_specs=out_spec,
        compiler_params=pltpu.CompilerParams(
            dimension_semantics=("parallel",),
            vmem_limit_bytes=vmem_bytes,
        ),
        cost_estimate=cost,
    )(x2d, *kernel_params)

    return out[:B]


def init_params(key):
    """Deterministic init mimicking torch.nn.Linear defaults.

    Weights stored transposed as (in, out); biases as (1, out). All f32.
    """
    ks = jax.random.split(key, 2 * len(LAYER_DIMS))
    params = []
    for idx, (fan_in, fan_out) in enumerate(LAYER_DIMS):
        bound = 1.0 / jnp.sqrt(float(fan_in))
        w = jax.random.uniform(ks[2 * idx], (fan_in, fan_out), jnp.float32,
                               -bound, bound)
        b = jax.random.uniform(ks[2 * idx + 1], (1, fan_out), jnp.float32,
                               -bound, bound)
        params.extend([w, b])
    return tuple(params)


def _reference_f32(x, params):
    x2d = jnp.reshape(x, (-1, IMAGE_SIZE)).astype(jnp.float32)
    h = x2d
    for i in range(len(LAYER_DIMS)):
        w, b = params[2 * i], params[2 * i + 1]
        h = jnp.maximum(h @ w + b, 0.0)
    return jax.nn.log_softmax(h, axis=1)


def _reference_bf16_fc0(x, params):
    """Mirrors kernel numerics: bf16 x/w0 with f32 accumulation, f32 for the rest."""
    x2d = jnp.reshape(x, (-1, IMAGE_SIZE)).astype(jnp.bfloat16)
    w0 = params[0].astype(jnp.bfloat16)
    h = jnp.dot(x2d, w0, preferred_element_type=jnp.float32) + params[1]
    h = jnp.maximum(h, 0.0)
    for i in range(1, len(LAYER_DIMS)):
        w, b = params[2 * i], params[2 * i + 1]
        h = jnp.maximum(h @ w + b, 0.0)
    return jax.nn.log_softmax(h, axis=1)


if __name__ == "__main__":
    key = jax.random.PRNGKey(0)
    k_x, k_p = jax.random.split(key)

    params = init_params(k_p)

    # Small MNIST-like batch: (8, 1, 28, 28) NCHW, flattened to (8, 784) inside.
    x = jax.random.normal(k_x, (8, 1, 28, 28), dtype=jnp.float32)
    out = jax.block_until_ready(model_e_forward(x, params))
    assert out.shape == (8, 10), out.shape
    # Tight check vs a reference mirroring the bf16 fc0 numerics.
    assert jnp.allclose(out, _reference_bf16_fc0(x, params), atol=1e-4, rtol=1e-4)
    # Loose sanity check vs the full-f32 (torch-equivalent) reference.
    assert jnp.allclose(out, _reference_f32(x, params), atol=5e-2, rtol=5e-2)

    # Larger batch: exercises multi-step grid, padding, and the >=2-step cap.
    x_big = jax.random.normal(k_x, (2048 + 17, 784), dtype=jnp.float32)
    out_big = jax.block_until_ready(model_e_forward(x_big, params, tile_b=512))
    assert out_big.shape == (2048 + 17, 10)
    assert jnp.allclose(out_big, _reference_bf16_fc0(x_big, params),
                        atol=1e-4, rtol=1e-4)

    # Odd tile_b exercises the round-to-multiple-of-8 fix from the review.
    out_odd = jax.block_until_ready(model_e_forward(x_big, params, tile_b=500))
    assert jnp.allclose(out_odd, out_big, atol=1e-6, rtol=1e-6)

    print("KERNEL_OK")
</pallas_src>

<mosaic_0001>
module attributes {stable_mosaic.version = 11 : i64} {
  func.func @_mlp_logsoftmax_kernel(%arg0: i32, %arg1: memref<8x784xbf16, #tpu.memory_space<vmem>>, %arg2: memref<784x128xbf16, #tpu.memory_space<vmem>>, %arg3: memref<1x128xf32, #tpu.memory_space<vmem>>, %arg4: memref<128x64xf32, #tpu.memory_space<vmem>>, %arg5: memref<1x64xf32, #tpu.memory_space<vmem>>, %arg6: memref<64x10xf32, #tpu.memory_space<vmem>>, %arg7: memref<1x10xf32, #tpu.memory_space<vmem>>, %arg8: memref<10x10xf32, #tpu.memory_space<vmem>>, %arg9: memref<1x10xf32, #tpu.memory_space<vmem>>, %arg10: memref<10x10xf32, #tpu.memory_space<vmem>>, %arg11: memref<1x10xf32, #tpu.memory_space<vmem>>, %arg12: memref<10x10xf32, #tpu.memory_space<vmem>>, %arg13: memref<1x10xf32, #tpu.memory_space<vmem>>, %arg14: memref<8x10xf32, #tpu.memory_space<vmem>>) attributes {dimension_semantics = [#tpu.dimension_semantics<parallel>], iteration_bounds = array<i64: 1>, scalar_prefetch = 0 : i64, scratch_operands = 0 : i64, tpu.core_type = #tpu.core_type<tc>, window_params = [{transform_indices = @transform_0, window_bounds = array<i64: 8, 784>}, {pipeline_mode = #tpu.pipeline_mode<synchronous>, transform_indices = @transform_1, window_bounds = array<i64: 784, 128>}, {pipeline_mode = #tpu.pipeline_mode<synchronous>, transform_indices = @transform_2, window_bounds = array<i64: 1, 128>}, {pipeline_mode = #tpu.pipeline_mode<synchronous>, transform_indices = @transform_3, window_bounds = array<i64: 128, 64>}, {pipeline_mode = #tpu.pipeline_mode<synchronous>, transform_indices = @transform_4, window_bounds = array<i64: 1, 64>}, {pipeline_mode = #tpu.pipeline_mode<synchronous>, transform_indices = @transform_5, window_bounds = array<i64: 64, 10>}, {pipeline_mode = #tpu.pipeline_mode<synchronous>, transform_indices = @transform_6, window_bounds = array<i64: 1, 10>}, {pipeline_mode = #tpu.pipeline_mode<synchronous>, transform_indices = @transform_7, window_bounds = array<i64: 10, 10>}, {pipeline_mode = #tpu.pipeline_mode<synchronous>, transform_indices = @transform_8, window_bounds = array<i64: 1, 10>}, {pipeline_mode = #tpu.pipeline_mode<synchronous>, transform_indices = @transform_9, window_bounds = array<i64: 10, 10>}, {pipeline_mode = #tpu.pipeline_mode<synchronous>, transform_indices = @transform_10, window_bounds = array<i64: 1, 10>}, {pipeline_mode = #tpu.pipeline_mode<synchronous>, transform_indices = @transform_11, window_bounds = array<i64: 10, 10>}, {pipeline_mode = #tpu.pipeline_mode<synchronous>, transform_indices = @transform_12, window_bounds = array<i64: 1, 10>}, {transform_indices = @transform_13, window_bounds = array<i64: 8, 10>}]} {
    %c0 = arith.constant 0 : index
    %c0_0 = arith.constant 0 : index
    %0 = vector.load %arg1[%c0, %c0_0] : memref<8x784xbf16, #tpu.memory_space<vmem>>, vector<8x784xbf16>
    %c0_1 = arith.constant 0 : index
    %c0_2 = arith.constant 0 : index
    %1 = vector.load %arg2[%c0_1, %c0_2] : memref<784x128xbf16, #tpu.memory_space<vmem>>, vector<784x128xbf16>
    %cst = arith.constant dense<0.000000e+00> : vector<8x128xf32>
    %2 = tpu.matmul %0, %1, %cst {dimension_numbers = #tpu.dot_dimension_numbers<[1], [0], [0], [1], [0, 0, 1, 1], [], []>} : vector<8x784xbf16>, vector<784x128xbf16>, vector<8x128xf32> -> vector<8x128xf32>
    %c0_3 = arith.constant 0 : index
    %c0_4 = arith.constant 0 : index
    %3 = vector.load %arg3[%c0_3, %c0_4] : memref<1x128xf32, #tpu.memory_space<vmem>>, vector<1x128xf32>
    %4 = vector.broadcast %3 : vector<1x128xf32> to vector<8x128xf32>
    %5 = arith.addf %2, %4 : vector<8x128xf32>
    %cst_5 = arith.constant 0.000000e+00 : f32
    %6 = vector.broadcast %cst_5 : f32 to vector<8x128xf32>
    %7 = arith.maximumf %5, %6 : vector<8x128xf32>
    %c0_6 = arith.constant 0 : index
    %c0_7 = arith.constant 0 : index
    %8 = vector.load %arg4[%c0_6, %c0_7] : memref<128x64xf32, #tpu.memory_space<vmem>>, vector<128x64xf32>
    %cst_8 = arith.constant dense<0.000000e+00> : vector<8x64xf32>
    %9 = tpu.matmul %7, %8, %cst_8 {dimension_numbers = #tpu.dot_dimension_numbers<[1], [0], [0], [1], [0, 0, 1, 1], [], []>} : vector<8x128xf32>, vector<128x64xf32>, vector<8x64xf32> -> vector<8x64xf32>
    %c0_9 = arith.constant 0 : index
    %c0_10 = arith.constant 0 : index
    %10 = vector.load %arg5[%c0_9, %c0_10] : memref<1x64xf32, #tpu.memory_space<vmem>>, vector<1x64xf32>
    %11 = vector.broadcast %10 : vector<1x64xf32> to vector<8x64xf32>
    %12 = arith.addf %9, %11 : vector<8x64xf32>
    %cst_11 = arith.constant 0.000000e+00 : f32
    %13 = vector.broadcast %cst_11 : f32 to vector<8x64xf32>
    %14 = arith.maximumf %12, %13 : vector<8x64xf32>
    %c0_12 = arith.constant 0 : index
    %c0_13 = arith.constant 0 : index
    %15 = vector.load %arg6[%c0_12, %c0_13] : memref<64x10xf32, #tpu.memory_space<vmem>>, vector<64x10xf32>
    %cst_14 = arith.constant dense<0.000000e+00> : vector<8x10xf32>
    %16 = tpu.matmul %14, %15, %cst_14 {dimension_numbers = #tpu.dot_dimension_numbers<[1], [0], [0], [1], [0, 0, 1, 1], [], []>} : vector<8x64xf32>, vector<64x10xf32>, vector<8x10xf32> -> vector<8x10xf32>
    %c0_15 = arith.constant 0 : index
    %c0_16 = arith.constant 0 : index
    %17 = vector.load %arg7[%c0_15, %c0_16] : memref<1x10xf32, #tpu.memory_space<vmem>>, vector<1x10xf32>
    %18 = vector.broadcast %17 : vector<1x10xf32> to vector<8x10xf32>
    %19 = arith.addf %16, %18 : vector<8x10xf32>
    %cst_17 = arith.constant 0.000000e+00 : f32
    %20 = vector.broadcast %cst_17 : f32 to vector<8x10xf32>
    %21 = arith.maximumf %19, %20 : vector<8x10xf32>
    %c0_18 = arith.constant 0 : index
    %c0_19 = arith.constant 0 : index
    %22 = vector.load %arg8[%c0_18, %c0_19] : memref<10x10xf32, #tpu.memory_space<vmem>>, vector<10x10xf32>
    %cst_20 = arith.constant dense<0.000000e+00> : vector<8x10xf32>
    %23 = tpu.matmul %21, %22, %cst_20 {dimension_numbers = #tpu.dot_dimension_numbers<[1], [0], [0], [1], [0, 0, 1, 1], [], []>} : vector<8x10xf32>, vector<10x10xf32>, vector<8x10xf32> -> vector<8x10xf32>
    %c0_21 = arith.constant 0 : index
    %c0_22 = arith.constant 0 : index
    %24 = vector.load %arg9[%c0_21, %c0_22] : memref<1x10xf32, #tpu.memory_space<vmem>>, vector<1x10xf32>
    %25 = vector.broadcast %24 : vector<1x10xf32> to vector<8x10xf32>
    %26 = arith.addf %23, %25 : vector<8x10xf32>
    %cst_23 = arith.constant 0.000000e+00 : f32
    %27 = vector.broadcast %cst_23 : f32 to vector<8x10xf32>
    %28 = arith.maximumf %26, %27 : vector<8x10xf32>
    %c0_24 = arith.constant 0 : index
    %c0_25 = arith.constant 0 : index
    %29 = vector.load %arg10[%c0_24, %c0_25] : memref<10x10xf32, #tpu.memory_space<vmem>>, vector<10x10xf32>
    %cst_26 = arith.constant dense<0.000000e+00> : vector<8x10xf32>
    %30 = tpu.matmul %28, %29, %cst_26 {dimension_numbers = #tpu.dot_dimension_numbers<[1], [0], [0], [1], [0, 0, 1, 1], [], []>} : vector<8x10xf32>, vector<10x10xf32>, vector<8x10xf32> -> vector<8x10xf32>
    %c0_27 = arith.constant 0 : index
    %c0_28 = arith.constant 0 : index
    %31 = vector.load %arg11[%c0_27, %c0_28] : memref<1x10xf32, #tpu.memory_space<vmem>>, vector<1x10xf32>
    %32 = vector.broadcast %31 : vector<1x10xf32> to vector<8x10xf32>
    %33 = arith.addf %30, %32 : vector<8x10xf32>
    %cst_29 = arith.constant 0.000000e+00 : f32
    %34 = vector.broadcast %cst_29 : f32 to vector<8x10xf32>
    %35 = arith.maximumf %33, %34 : vector<8x10xf32>
    %c0_30 = arith.constant 0 : index
    %c0_31 = arith.constant 0 : index
    %36 = vector.load %arg12[%c0_30, %c0_31] : memref<10x10xf32, #tpu.memory_space<vmem>>, vector<10x10xf32>
    %cst_32 = arith.constant dense<0.000000e+00> : vector<8x10xf32>
    %37 = tpu.matmul %35, %36, %cst_32 {dimension_numbers = #tpu.dot_dimension_numbers<[1], [0], [0], [1], [0, 0, 1, 1], [], []>} : vector<8x10xf32>, vector<10x10xf32>, vector<8x10xf32> -> vector<8x10xf32>
    %c0_33 = arith.constant 0 : index
    %c0_34 = arith.constant 0 : index
    %38 = vector.load %arg13[%c0_33, %c0_34] : memref<1x10xf32, #tpu.memory_space<vmem>>, vector<1x10xf32>
    %39 = vector.broadcast %38 : vector<1x10xf32> to vector<8x10xf32>
    %40 = arith.addf %37, %39 : vector<8x10xf32>
    %cst_35 = arith.constant 0.000000e+00 : f32
    %41 = vector.broadcast %cst_35 : f32 to vector<8x10xf32>
    %42 = arith.maximumf %40, %41 : vector<8x10xf32>
    %cst_36 = arith.constant dense<0xFF800000> : vector<8xf32>
    %43 = vector.multi_reduction <maximumf>, %42, %cst_36 [1] : vector<8x10xf32> to vector<8xf32>
    %44 = vector.shape_cast %43 : vector<8xf32> to vector<8x1xf32>
    %45 = vector.broadcast %44 : vector<8x1xf32> to vector<8x10xf32>
    %46 = arith.subf %42, %45 : vector<8x10xf32>
    %47 = math.exp %46 : vector<8x10xf32>
    %cst_37 = arith.constant dense<0.000000e+00> : vector<8xf32>
    %48 = vector.multi_reduction <add>, %47, %cst_37 [1] : vector<8x10xf32> to vector<8xf32>
    %49 = vector.shape_cast %48 : vector<8xf32> to vector<8x1xf32>
    %50 = math.log %49 : vector<8x1xf32>
    %51 = vector.broadcast %50 : vector<8x1xf32> to vector<8x10xf32>
    %52 = arith.subf %46, %51 : vector<8x10xf32>
    %c0_38 = arith.constant 0 : index
    %c0_39 = arith.constant 0 : index
    %53 = vector.load %arg14[%c0_38, %c0_39] : memref<8x10xf32, #tpu.memory_space<vmem>>, vector<8x10xf32>
    tpu.vector_store %arg14[%c0_38, %c0_39], %52 {strides = array<i32>} : memref<8x10xf32, #tpu.memory_space<vmem>>, vector<8x10xf32>,
    return
  }
  func.func @transform_0(%arg0: i32) -> (i32, i32) {
    %c0_i32 = arith.constant 0 : i32
    %c0_i32_0 = arith.constant 0 : i32
    return %arg0, %c0_i32 : i32, i32
  }
  func.func @transform_1(%arg0: i32) -> (i32, i32) {
    %c0_i32 = arith.constant 0 : i32
    %c0_i32_0 = arith.constant 0 : i32
    %c0_i32_1 = arith.constant 0 : i32
    return %c0_i32, %c0_i32_0 : i32, i32
  }
  func.func @transform_2(%arg0: i32) -> (i32, i32) {
    %c0_i32 = arith.constant 0 : i32
    %c0_i32_0 = arith.constant 0 : i32
    %c0_i32_1 = arith.constant 0 : i32
    return %c0_i32, %c0_i32_0 : i32, i32
  }
  func.func @transform_3(%arg0: i32) -> (i32, i32) {
    %c0_i32 = arith.constant 0 : i32
    %c0_i32_0 = arith.constant 0 : i32
    %c0_i32_1 = arith.constant 0 : i32
    return %c0_i32, %c0_i32_0 : i32, i32
  }
  func.func @transform_4(%arg0: i32) -> (i32, i32) {
    %c0_i32 = arith.constant 0 : i32
    %c0_i32_0 = arith.constant 0 : i32
    %c0_i32_1 = arith.constant 0 : i32
    return %c0_i32, %c0_i32_0 : i32, i32
  }
  func.func @transform_5(%arg0: i32) -> (i32, i32) {
    %c0_i32 = arith.constant 0 : i32
    %c0_i32_0 = arith.constant 0 : i32
    %c0_i32_1 = arith.constant 0 : i32
    return %c0_i32, %c0_i32_0 : i32, i32
  }
  func.func @transform_6(%arg0: i32) -> (i32, i32) {
    %c0_i32 = arith.constant 0 : i32
    %c0_i32_0 = arith.constant 0 : i32
    %c0_i32_1 = arith.constant 0 : i32
    return %c0_i32, %c0_i32_0 : i32, i32
  }
  func.func @transform_7(%arg0: i32) -> (i32, i32) {
    %c0_i32 = arith.constant 0 : i32
    %c0_i32_0 = arith.constant 0 : i32
    %c0_i32_1 = arith.constant 0 : i32
    return %c0_i32, %c0_i32_0 : i32, i32
  }
  func.func @transform_8(%arg0: i32) -> (i32, i32) {
    %c0_i32 = arith.constant 0 : i32
    %c0_i32_0 = arith.constant 0 : i32
    %c0_i32_1 = arith.constant 0 : i32
    return %c0_i32, %c0_i32_0 : i32, i32
  }
  func.func @transform_9(%arg0: i32) -> (i32, i32) {
    %c0_i32 = arith.constant 0 : i32
    %c0_i32_0 = arith.constant 0 : i32
    %c0_i32_1 = arith.constant 0 : i32
    return %c0_i32, %c0_i32_0 : i32, i32
  }
  func.func @transform_10(%arg0: i32) -> (i32, i32) {
    %c0_i32 = arith.constant 0 : i32
    %c0_i32_0 = arith.constant 0 : i32
    %c0_i32_1 = arith.constant 0 : i32
    return %c0_i32, %c0_i32_0 : i32, i32
  }
  func.func @transform_11(%arg0: i32) -> (i32, i32) {
    %c0_i32 = arith.constant 0 : i32
    %c0_i32_0 = arith.constant 0 : i32
    %c0_i32_1 = arith.constant 0 : i32
    return %c0_i32, %c0_i32_0 : i32, i32
  }
  func.func @transform_12(%arg0: i32) -> (i32, i32) {
    %c0_i32 = arith.constant 0 : i32
    %c0_i32_0 = arith.constant 0 : i32
    %c0_i32_1 = arith.constant 0 : i32
    return %c0_i32, %c0_i32_0 : i32, i32
  }
  func.func @transform_13(%arg0: i32) -> (i32, i32) {
    %c0_i32 = arith.constant 0 : i32
    %c0_i32_0 = arith.constant 0 : i32
    return %arg0, %c0_i32 : i32, i32
  }
}

</mosaic_0001>

<bundles_post_ra>
// kernel: model_e_forward.1
= control target key start
LH: loop header
LB: loop body
LE: loop exit
PB: predicated region body
PF: predicated region fallthrough
CT: control target
= control target key end

     0   :  { %v1448_v43 = vmov 0.0   ;;  %vm1449_vm0 = vmmov 0   ;;  %s1843_s0 = inlined_call_operand.vmem [shape: bf16[8,784], index: 0, kind: input, shape index: {}]   ;;  %s1844_s1 = inlined_call_operand.vmem [shape: bf16[784,128], index: 1, kind: input, shape index: {}]   ;;  %s1845_s2 = inlined_call_operand.vmem [shape: f32[1,128], index: 2, kind: input, shape index: {}]   ;;  %s1846_s3 = inlined_call_operand.vmem [shape: f32[128,64], index: 3, kind: input, shape index: {}]   ;;  %s1847_s4 = inlined_call_operand.vmem [shape: f32[1,64], index: 4, kind: input, shape index: {}]   ;;  %s1848_s5 = inlined_call_operand.vmem [shape: f32[64,10], index: 5, kind: input, shape index: {}]   ;;  %s1849_s6 = inlined_call_operand.vmem [shape: f32[1,10], index: 6, kind: input, shape index: {}]   ;;  %s1850_s7 = inlined_call_operand.vmem [shape: f32[10,10], index: 7, kind: input, shape index: {}]   ;;  %s1851_s8 = inlined_call_operand.vmem [shape: f32[1,10], index: 8, kind: input, shape index: {}]   ;;  %s1852_s9 = inlined_call_operand.vmem [shape: f32[10,10], index: 9, kind: input, shape index: {}]   ;;  %s1853_s10 = inlined_call_operand.vmem [shape: f32[1,10], index: 10, kind: input, shape index: {}]   ;;  %s1854_s11 = inlined_call_operand.vmem [shape: f32[10,10], index: 11, kind: input, shape index: {}]   ;;  %s1855_s12 = inlined_call_operand.vmem [shape: f32[1,10], index: 12, kind: input, shape index: {}]   ;;  %s1856_s13 = inlined_call_operand.hbm [shape: f32[8,10], index: 13, kind: output, shape index: {}]  }
   0x1   :  { %v1366_v0 = vld [vmem:[%s1844_s1 + $0x78] sm:$0xff]   ;;  %v1370_v4 = vld [vmem:[%s1844_s1 + $0x70] sm:$0xff]   ;;  %v1374_v8 = vld [vmem:[%s1844_s1 + $0x68] sm:$0xff]  }
   0x2   :  { %v1367_v1 = vld [vmem:[%s1844_s1 + $0x38] sm:$0xff]   ;;  %1179 = vmatprep.subr.bf16.mxu0 %v1366_v0  ;;  %v1371_v5 = vld [vmem:[%s1844_s1 + $0x30] sm:$0xff]   ;;  %v1375_v9 = vld [vmem:[%s1844_s1 + $0x28] sm:$0xff]  }
   0x3   :  { %v1368_v2 = vld [vmem:[%s1844_s1 + $0xf8] sm:$0xff]   ;;  %1180 = vmatpush3.bf16.msra.mxu0 %v1367_v1  ;;  %v1372_v6 = vld [vmem:[%s1844_s1 + $0xf0] sm:$0xff]   ;;  %v1376_v10 = vld [vmem:[%s1844_s1 + $0xe8] sm:$0xff]  }
   0x4   :  { %v1369_v3 = vld [vmem:[%s1844_s1 + $0xb8] sm:$0xff]   ;;  %1201 = vmatprep.subr.bf16.mxu1 %v1368_v2  ;;  %1181 = vmatprep.subr.bf16.mxu0 %v1370_v4  ;;  %v1373_v7 = vld [vmem:[%s1844_s1 + $0xb0] sm:$0xff]   ;;  %v1377_v11 = vld [vmem:[%s1844_s1 + $0xa8] sm:$0xff]  }
   0x5   :  { %1202 = vmatpush3.bf16.msra.mxu1 %v1369_v3  ;;  %v1378_v12 = vld [vmem:[%s1844_s1 + $0x60] sm:$0xff]   ;;  %v1382_v16 = vld [vmem:[%s1844_s1 + $0x58] sm:$0xff]   ;;  %v1386_v20 = vld [vmem:[%s1844_s1 + $0x50] sm:$0xff]  }
   0x6   :  { %1203 = vmatprep.subr.bf16.mxu1 %v1372_v6  ;;  %v1379_v13 = vld [vmem:[%s1844_s1 + $0x20] sm:$0xff]   ;;  %v1383_v17 = vld [vmem:[%s1844_s1 + $0x18] sm:$0xff]   ;;  %v1387_v21 = vld [vmem:[%s1844_s1 + $0x10] sm:$0xff]  }
   0x7   :  { %1182 = vmatpush3.bf16.msra.mxu0 %v1371_v5  ;;  %v1380_v14 = vld [vmem:[%s1844_s1 + $0xe0] sm:$0xff]   ;;  %v1384_v18 = vld [vmem:[%s1844_s1 + $0xd8] sm:$0xff]   ;;  %v1388_v22 = vld [vmem:[%s1844_s1 + $0xd0] sm:$0xff]  }
   0x8   :  { %1183 = vmatprep.subr.bf16.mxu0 %v1374_v8  ;;  %v1381_v15 = vld [vmem:[%s1844_s1 + $0xa0] sm:$0xff]   ;;  %v1385_v19 = vld [vmem:[%s1844_s1 + $0x98] sm:$0xff]   ;;  %v1389_v23 = vld [vmem:[%s1844_s1 + $0x90] sm:$0xff]  }
   0x9   :  { %1204 = vmatpush3.bf16.msra.mxu1 %v1373_v7  ;;  %v1390_v24 = vld [vmem:[%s1844_s1 + $0x48] sm:$0xff]   ;;  %v1394_v28 = vld [vmem:[%s1844_s1 + $0x40] sm:$0xff]   ;;  %v1400_v35 = vld [vmem:[%s1844_s1 + $0x178] sm:$0xff]  }
   0xa   :  { %1205 = vmatprep.subr.bf16.mxu1 %v1376_v10  ;;  %v1391_v25 = vld [vmem:[%s1844_s1 + $0x8] sm:$0xff]   ;;  %v1395_v29 = vld [vmem:[%s1844_s1] sm:$0xff]   ;;  %v1403_v39 = vld [vmem:[%s1844_s1 + $0x138] sm:$0xff]  }
   0xb   :  { %1184 = vmatpush3.bf16.msra.mxu0 %v1375_v9  ;;  %v1392_v26 = vld [vmem:[%s1844_s1 + $0xc8] sm:$0xff]   ;;  %v1396_v30 = vld [vmem:[%s1844_s1 + $0xc0] sm:$0xff]   ;;  %v1404_v40 = vld [vmem:[%s1844_s1 + $0x170] sm:$0xff]  }
   0xc   :  { %1185 = vmatprep.subr.bf16.mxu0 %v1378_v12  ;;  %v1393_v27 = vld [vmem:[%s1844_s1 + $0x88] sm:$0xff]   ;;  %v46_v31 = vld [vmem:[%s1843_s0] sm:$0xff]  ;;  %v1405_v41 = vld [vmem:[%s1844_s1 + $0x130] sm:$0xff]  }
   0xd   :  { %1206 = vmatpush3.bf16.msra.mxu1 %v1377_v11  ;;  %v1110_v32 = vcombine.low %v46_v31, %v46_v31  ;;  %v1111_v33 = vcombine.high %v46_v31, %v46_v31  ;;  %v1399_v34 = vld [vmem:[%s1844_s1 + $0x80] sm:$0xff]   ;;  %v47_v36 = vld [vmem:[%s1843_s0 + $0x8] sm:$0xff]  ;;  %v1410_v47 = vld [vmem:[%s1844_s1 + $0x158] sm:$0xff]  }
   0xe   :  { %1207 = vmatprep.subr.bf16.mxu1 %v1380_v14  ;;  %v1112_v37 = vcombine.low %v47_v36, %v47_v36  ;;  %v1113_v38 = vcombine.high %v47_v36, %v47_v36  ;;  %v1406_v42 = vld [vmem:[%s1844_s1 + $0x168] sm:$0xff]   ;;  %v1408_v45 = vld [vmem:[%s1844_s1 + $0x160] sm:$0xff]   ;;  %v1411_v48 = vld [vmem:[%s1844_s1 + $0x118] sm:$0xff]  }
   0xf   :  { %1186 = vmatpush3.bf16.msra.mxu0 %v1379_v13  ;;  %509 = vmatprep.mubr.bf16.mxu0 %v1111_v33  ;;  %v1407_v44 = vld [vmem:[%s1844_s1 + $0x128] sm:$0xff]   ;;  %v1409_v46 = vld [vmem:[%s1844_s1 + $0x120] sm:$0xff]   ;;  %v1412_v49 = vld [vmem:[%s1844_s1 + $0x150] sm:$0xff]  }
  0x10   :  { %1187 = vmatprep.subr.bf16.mxu0 %v1382_v16  ;;  %549 = vmatprep.mubr.bf16.mxu1 %v1113_v38  ;;  %v1418_v50 = vld [vmem:[%s1844_s1 + $0x180] sm:$0xff]   ;;  %v48_v51 = vld [vmem:[%s1843_s0 + $0x10] sm:$0xff]  ;;  %v1421_v53 = vld [vmem:[%s1843_s0 + $0x18] ss:$0 sps:$4 sm:$0xff]  }
  0x11   :  { %1208 = vmatpush3.bf16.msra.mxu1 %v1381_v15  ;;  %v1115_v52 = vcombine.high %v48_v51, %v48_v51 }
  0x12   :  { %1209 = vmatprep.subr.bf16.mxu1 %v1384_v18 }
  0x13   :  { %1188 = vmatpush3.bf16.msra.mxu0 %v1383_v17 }
  0x14   :  { %1189 = vmatprep.subr.bf16.mxu0 %v1386_v20 }
  0x15   :  { %1210 = vmatpush3.bf16.msra.mxu1 %v1385_v19 }
  0x16   :  { %1211 = vmatprep.subr.bf16.mxu1 %v1388_v22 }
  0x17   :  { %1190 = vmatpush3.bf16.msra.mxu0 %v1387_v21 }
  0x18   :  { %1191 = vmatprep.subr.bf16.mxu0 %v1390_v24 }
  0x19   :  { %1212 = vmatpush3.bf16.msra.mxu1 %v1389_v23 }
  0x1a   :  { %1213 = vmatprep.subr.bf16.mxu1 %v1392_v26 }
  0x1b   :  { %1192 = vmatpush3.bf16.msra.mxu0 %v1391_v25 }
  0x1c   :  { %1193 = vmatprep.subr.bf16.mxu0 %v1394_v28 }
  0x1d   :  { %1214 = vmatpush3.bf16.msra.mxu1 %v1393_v27 }
  0x1e   :  { %1215 = vmatprep.subr.bf16.mxu1 %v1396_v30 }
  0x1f   :  { %1194 = vmatpush3.bf16.msra.mxu0 %v1395_v29 }
  0x20   :  { %1223 = vmatprep.subr.bf16.mxu0 %v1400_v35 }
  0x21   :  { %1216 = vmatpush3.bf16.msra.mxu1 %v1399_v34 }
  0x22   :  { %510 = vmatmul.mubr.bf16.vlgmr.msra.gmra.mxu0 %v1110_v32  ;;  %1282 = vmatprep.subr.bf16.mxu1 %v1448_v43 }
  0x23   :  { %1224 = vmatpush3.bf16.msra.mxu0 %v1403_v39 }
  0x24   :  { %550 = vmatmul.mubr.bf16.vlgmr.msra.gmra.mxu1 %v1112_v37  ;;  %1225 = vmatprep.subr.bf16.mxu0 %v1404_v40 }
  0x25   :  { %1284 = vmatprep.mubr.msk.bf16.mxu1 %vm1449_vm0, %v1448_v43 }
  0x27   :  { %1226 = vmatpush3.bf16.msra.mxu0 %v1405_v41 }
  0x28   :  { %1227 = vmatprep.subr.bf16.mxu0 %v1406_v42 }
  0x2b   :  { %1228 = vmatpush3.bf16.msra.mxu0 %v1407_v44 }
  0x2c   :  { %1229 = vmatprep.subr.bf16.mxu0 %v1408_v45 }
  0x2f   :  { %1230 = vmatpush3.bf16.msra.mxu0 %v1409_v46 }
  0x30   :  { %1231 = vmatprep.subr.bf16.mxu0 %v1410_v47 }
  0x31   :  { %18 = vsyncpa [#allocation3], 0  ;;  %1283 = vmatpush3.bf16.msra.mxu1 %v1418_v50  ;;  %vm473_vm1 = vcmask 130048   ;;  %v1413_v54 = vld [vmem:[%s1844_s1 + $0x110] sm:$0xff]   ;;  %589 = vmatprep.mubr.bf16.mxu0 %v1115_v52  ;;  %v1414_v55 = vld [vmem:[%s1844_s1 + $0x148] sm:$0xff]   ;;  %v1114_v59 = vcombine.low %v48_v51, %v48_v51  ;;  %vm747_vm2 = vcmask 523264  }
  0x32   :  { %1288 = vmatprep.subr.mxu1 %v1448_v43  ;;  %v1415_v56 = vld [vmem:[%s1844_s1 + $0x108] sm:$0xff]   ;;  %v1416_v57 = vld [vmem:[%s1844_s1 + $0x140] sm:$0xff]   ;;  %v653_v60 = vld [vmem:[%s1846_s3 + $0x78] sm:$0xff]  ;;  %vm835_vm3 = vcmask 1041408   ;;  %vm831_vm4 = vcmask 80896  }
  0x33   :  { %1232 = vmatpush3.bf16.msra.mxu0 %v1411_v48  ;;  %v1417_v58 = vld [vmem:[%s1844_s1 + $0x100] sm:$0xff]   ;;  %v652_v61 = vld [vmem:[%s1846_s3 + $0x70] sm:$0xff]  ;;  %v651_v62 = vld [vmem:[%s1846_s3 + $0x68] sm:$0xff] }
  0x34   :  { %1233 = vmatprep.subr.bf16.mxu0 %v1412_v49  ;;  %1285 = vmatmul.mubr.msk.bf16.vlgmr.msra.gmra.mxu1 %vm473_vm1, %v1421_v53  ;;  %v650_v63 = vld [vmem:[%s1846_s3 + $0x60] sm:$0xff]  ;;  %v649_v0 = vld [vmem:[%s1846_s3 + $0x58] sm:$0xff]  ;;  %v648_v1 = vld [vmem:[%s1846_s3 + $0x50] sm:$0xff] }
  0x35   :  { %1320 = vmatprep.mubr.msk.f32.mxu1 %vm1449_vm0, %v1448_v43  ;;  %1289 = vmatpush3.msra.mxu1 %v653_v60  ;;  %v647_v2 = vld [vmem:[%s1846_s3 + $0x48] sm:$0xff]  ;;  %v646_v3 = vld [vmem:[%s1846_s3 + $0x40] sm:$0xff]  ;;  %v645_v4 = vld [vmem:[%s1846_s3 + $0x38] sm:$0xff] }
  0x36   :  { %1290 = vmatprep.subr.mxu1 %v1448_v43  ;;  %v644_v5 = vld [vmem:[%s1846_s3 + $0x30] sm:$0xff]  ;;  %v643_v6 = vld [vmem:[%s1846_s3 + $0x28] sm:$0xff]  ;;  %v642_v7 = vld [vmem:[%s1846_s3 + $0x20] sm:$0xff] }
  0x37   :  { %1234 = vmatpush3.bf16.msra.mxu0 %v1413_v54  ;;  %1291 = vmatpush3.msra.mxu1 %v652_v61  ;;  %v641_v8 = vld [vmem:[%s1846_s3 + $0x18] sm:$0xff]  ;;  %v640_v9 = vld [vmem:[%s1846_s3 + $0x10] sm:$0xff]  ;;  %v639_v10 = vld [vmem:[%s1846_s3 + $0x8] sm:$0xff] }
  0x38   :  { %1235 = vmatprep.subr.bf16.mxu0 %v1414_v55  ;;  %1292 = vmatprep.subr.mxu1 %v1448_v43  ;;  %v638_v11 = vld [vmem:[%s1846_s3] sm:$0xff]  ;;  %v739_v12 = vld [vmem:[%s1848_s5 + $0x38] sm:$0xff]  ;;  %v738_v13 = vld [vmem:[%s1848_s5 + $0x30] sm:$0xff] }
  0x39   :  { %1293 = vmatpush3.msra.mxu1 %v651_v62  ;;  %v737_v14 = vld [vmem:[%s1848_s5 + $0x28] sm:$0xff]  ;;  %v736_v15 = vld [vmem:[%s1848_s5 + $0x20] sm:$0xff]  ;;  %v735_v16 = vld [vmem:[%s1848_s5 + $0x18] sm:$0xff] }
  0x3a   :  { %1294 = vmatprep.subr.mxu1 %v1448_v43  ;;  %v1109_v30 = vld [vmem:[%s1845_s2] ss:$0 sm:$0xff]  ;;  %v734_v42 = vld [vmem:[%s1848_s5 + $0x10] sm:$0xff]  ;;  %v733_v44 = vld [vmem:[%s1848_s5 + $0x8] sm:$0xff] }
  0x3b   :  { %1236 = vmatpush3.bf16.msra.mxu0 %v1415_v56  ;;  %1295 = vmatpush3.msra.mxu1 %v650_v63  ;;  %v732_v45 = vld [vmem:[%s1848_s5] sm:$0xff]  ;;  %v823_v51 = vld [vmem:[%s1850_s7 + $0x8] sm:$0x3] }
  0x3c   :  { %1237 = vmatprep.subr.bf16.mxu0 %v1416_v57  ;;  %1296 = vmatprep.subr.mxu1 %v1448_v43  ;;  %v1167_v46 = vld [vmem:[%s1847_s4] ss:$0 sm:$0xff] }
  0x3d   :  { %1297 = vmatpush3.msra.mxu1 %v649_v0  ;;  %v822_v52 = vld [vmem:[%s1850_s7] sm:$0xff] }
  0x3e   :  { %1298 = vmatprep.subr.mxu1 %v1448_v43  ;;  %v1168_v53 = vld [vmem:[%s1849_s6] ss:$0 sm:$0xff] }
  0x3f   :  { %1238 = vmatpush3.bf16.msra.mxu0 %v1417_v58  ;;  %1299 = vmatpush3.msra.mxu1 %v648_v1  ;;  %v911_v58 = vld [vmem:[%s1852_s9 + $0x8] sm:$0x3]  ;;  %v1170_v60 = vld [vmem:[%s1851_s8] ss:$0 sm:$0xff] }
  0x40   :  { %1323 = vmatprep.subr.mxu0 %v1448_v43  ;;  %1300 = vmatprep.subr.mxu1 %v1448_v43  ;;  %v997_v1 = vld [vmem:[%s1854_s11 + $0x8] sm:$0x3] }
  0x41   :  { %1301 = vmatpush3.msra.mxu1 %v647_v2  ;;  %v996_v2 = vld [vmem:[%s1854_s11] sm:$0xff] }
  0x42   :  { %590 = vmatmul.mubr.bf16.vlgmr.msra.gmra.mxu0 %v1114_v59  ;;  %1302 = vmatprep.subr.mxu1 %v1448_v43  ;;  %v910_v59 = vld [vmem:[%s1852_s9] sm:$0xff] }
  0x43   :  { %1339 = vmatprep.mubr.msk.f32.mxu0 %vm1449_vm0, %v1448_v43  ;;  %1303 = vmatpush3.msra.mxu1 %v646_v3  ;;  %v1173_v3 = vld [vmem:[%s1853_s10] ss:$0 sm:$0xff]  ;;  %s1450_s10 = smov [#allocation2]  }
  0x44   :  { %1304 = vmatprep.subr.mxu1 %v1448_v43  ;;  %1324 = vmatpush3.msra.mxu0 %v739_v12  ;;  %s1101_s11 = sshll.u32 %s1450_s10, 4  ;;  %s1102_s11 = int_to_ptr.vmem [resolvable:$true] %s1101_s11 }
  0x45   :  { %1305 = vmatpush3.msra.mxu1 %v645_v4  ;;  %1325 = vmatprep.subr.mxu0 %v1448_v43  ;;  %p1431_p1 = scmp.lt.s32.totalorder %s1102_s11, %s1102_s11 }
  0x46   :  { %1306 = vmatprep.subr.mxu1 %v1448_v43  ;;  %1326 = vmatpush3.msra.mxu0 %v738_v13 }
  0x47   :  { %1307 = vmatpush3.msra.mxu1 %v644_v5  ;;  %1327 = vmatprep.subr.mxu0 %v1448_v43 }
  0x48   :  { %1308 = vmatprep.subr.mxu1 %v1448_v43  ;;  %1328 = vmatpush3.msra.mxu0 %v737_v14 }
  0x49   :  { %1309 = vmatpush3.msra.mxu1 %v643_v6  ;;  %1329 = vmatprep.subr.mxu0 %v1448_v43 }
  0x4a   :  { %1310 = vmatprep.subr.mxu1 %v1448_v43  ;;  %1330 = vmatpush3.msra.mxu0 %v736_v15 }
  0x4b   :  { %1311 = vmatpush3.msra.mxu1 %v642_v7  ;;  %1331 = vmatprep.subr.mxu0 %v1448_v43 }
  0x4c   :  { %1312 = vmatprep.subr.mxu1 %v1448_v43  ;;  %1332 = vmatpush3.msra.mxu0 %v735_v16 }
  0x4d   :  { %1313 = vmatpush3.msra.mxu1 %v641_v8  ;;  %1333 = vmatprep.subr.mxu0 %v1448_v43  ;;  %v1176_v8 = vld [vmem:[%s1855_s12] ss:$0 sm:$0xff]  ;;  %s1426_s12 = scalar_lea.vmem %s1102_s11, 128 }
  0x4e   :  { %1314 = vmatprep.subr.mxu1 %v1448_v43  ;;  %1334 = vmatpush3.msra.mxu0 %v734_v42  ;;  %p1427_p0 = scmp.ne.s32.totalorder %s1102_s11, %s1426_s12  ;;  %p1432_p2 = scmp.lt.s32.totalorder %s1426_s12, %s1426_s12 }
  0x4f   :  { %1315 = vmatpush3.msra.mxu1 %v640_v9  ;;  %1335 = vmatprep.subr.mxu0 %v1448_v43 }
  0x50   :  { %1316 = vmatprep.subr.mxu1 %v1448_v43  ;;  %1336 = vmatpush3.msra.mxu0 %v733_v44  ;;  %p1433_p3 = por %p1432_p2, %p1431_p1 }
  0x51   :  { %1317 = vmatpush3.msra.mxu1 %v639_v10  ;;  %1337 = vmatprep.subr.mxu0 %v1448_v43 }
  0x52   :  { %1318 = vmatprep.subr.mxu1 %v1448_v43  ;;  %1338 = vmatpush3.msra.mxu0 %v732_v45  ;;  %p1434_p4 = pnand %p1433_p3, %p1427_p0 }
  0x53   :  { %1319 = vmatpush3.msra.mxu1 %v638_v11  ;;  %1356 = vmatprep.subr.mxu0 %v1448_v43 }
  0x54   :  { %1342 = vmatprep.subr.mxu1 %v1448_v43 }
  0xe2   :  { %v1195_v17 = vpop.f32.mrf.mxu0 }
  0xe4   :  { %v1196_v18 = vpop.f32.mrf.mxu0  ;;  %v1217_v19 = vpop.f32.mrf.mxu1 }
  0xe5   :  { %v1197_v29 = vadd.f32 %v1196_v18, %v1195_v17 }
  0xe6   :  { %v1198_v20 = vpop.f32.mrf.mxu0  ;;  %v1218_v21 = vpop.f32.mrf.mxu1 }
  0xe7   :  { %v512_v31 = vadd.f32 %v1197_v29, %v1109_v30  ;;  %v1219_v32 = vadd.f32 %v1218_v21, %v1217_v19 }
  0xe8   :  { %v1199_v22 = vpop.f32.mrf.mxu0  ;;  %v1220_v23 = vpop.f32.mrf.mxu1 }
  0xe9   :  { %v552_v35 = vadd.f32 %v1219_v32, %v512_v31 }
  0xea   :  { %v1221_v24 = vpop.f32.mrf.mxu1 }
  0xf4   :  { %v631_v25 = vpop.f32.mrf.mxu1 }
  0xf6   :  { %v1286_v26 = vpop.f32.mrf.mxu1 }
  0xf8   :  { %v634_v27 = vpop.f32.mrf.mxu1 }
  0xfa   :  { %v1287_v28 = vpop.f32.mrf.mxu1 }
 0x102   :  { %v1239_v33 = vpop.f32.mrf.mxu0 }
 0x104   :  { %v1240_v34 = vpop.f32.mrf.mxu0 }
 0x105   :  { %v1241_v36 = vadd.f32 %v1240_v34, %v1239_v33 }
 0x106   :  { %v1242_v37 = vpop.f32.mrf.mxu0 }
 0x107   :  { %v592_v38 = vadd.f32 %v1241_v36, %v552_v35 }
 0x108   :  { %v1243_v39 = vpop.f32.mrf.mxu0 }
 0x109   :  { %v632_v40 = vadd.f32 %v631_v25, %v592_v38 }
 0x10b   :  { %v637_v41 = vmax.f32 %v632_v40, 0.0 }
 0x10d   :  { %1321 = vmatmul.mubr.f32.vlgmr.msra.gmra.mxu1 %v637_v41 }
 0x10e   :  { %1346 = vmatprep.mubr.msk.f32.mxu1 %vm1449_vm0, %v1448_v43  ;;  %1343 = vmatpush3.msk.msra.mxu1 %vm835_vm3, %v823_v51 }
 0x10f   :  { %1344 = vmatprep.subr.mxu1 %v1448_v43 }
 0x110   :  { %1345 = vmatpush3.msra.mxu1 %v822_v52 }
 0x111   :  { %1349 = vmatprep.subr.mxu1 %v1448_v43 }
 0x1cd   :  { %v727_v47 = vpop.f32.mrf.mxu1 }
 0x1ce   :  { %v728_v48 = vadd.f32 %v1167_v46, %v727_v47 }
 0x1cf   :  { %v1322_v49 = vpop.f32.mrf.mxu1 }
 0x1d0   :  { %v731_v50 = vmax.f32 %v728_v48, 0.0 }
 0x1d2   :  { %1340 = vmatmul.mubr.msk.f32.vlgmr.msra.gmra.mxu0 %vm747_vm2, %v731_v50 }
 0x1d3   :  { %1360 = vmatprep.mubr.msk.f32.mxu0 %vm1449_vm0, %v1448_v43  ;;  %1357 = vmatpush3.msk.msra.mxu0 %vm835_vm3, %v997_v1 }
 0x1d4   :  { %1358 = vmatprep.subr.mxu0 %v1448_v43 }
 0x1d5   :  { %1359 = vmatpush3.msra.mxu0 %v996_v2 }
 0x292   :  { %v817_v54 = vpop.f32.mrf.mxu0 }
 0x293   :  { %v818_v55 = vadd.f32 %v1168_v53, %v817_v54 }
 0x294   :  { %v1341_v56 = vpop.f32.mrf.mxu0 }
 0x295   :  { %v821_v57 = vmax.f32 %v818_v55, 0.0 }
 0x297   :  { %1347 = vmatmul.mubr.msk.f32.vlgmr.msra.gmra.mxu1 %vm831_vm4, %v821_v57 }
 0x298   :  { %1353 = vmatprep.mubr.msk.f32.mxu1 %vm1449_vm0, %v1448_v43  ;;  %1350 = vmatpush3.msk.msra.mxu1 %vm835_vm3, %v911_v58 }
 0x299   :  { %1351 = vmatprep.subr.mxu1 %v1448_v43 }
 0x29a   :  { %1352 = vmatpush3.msra.mxu1 %v910_v59 }
 0x357   :  { %v905_v61 = vpop.f32.mrf.mxu1 }
 0x358   :  { %v906_v62 = vadd.f32 %v1170_v60, %v905_v61 }
 0x359   :  { %v1348_v63 = vpop.f32.mrf.mxu1 }
 0x35a   :  { %v909_v0 = vmax.f32 %v906_v62, 0.0 }
 0x35c   :  { %1354 = vmatmul.mubr.msk.f32.vlgmr.msra.gmra.mxu1 %vm831_vm4, %v909_v0 }
 0x41c   :  { %v991_v4 = vpop.f32.mrf.mxu1 }
 0x41d   :  { %v992_v5 = vadd.f32 %v1173_v3, %v991_v4 }
 0x41e   :  { %v1355_v6 = vpop.f32.mrf.mxu1 }
 0x41f   :  { %v995_v7 = vmax.f32 %v992_v5, 0.0 }
 0x421   :  { %1361 = vmatmul.mubr.msk.f32.vlgmr.msra.gmra.mxu0 %vm831_vm4, %v995_v7 }
 0x4e1   :  { %v1077_v43 = vpop.f32.mrf.mxu0 }
 0x4e2   :  { %v1078_v9 = vadd.f32 %v1176_v8, %v1077_v43 }
 0x4e3   :  { %v1362_v10 = vpop.f32.mrf.mxu0 }
 0x4e4   :  { %v1081_v11 = vmax.f32 %v1078_v9, 0.0 }
 0x4e6   :  { %v1082_v12 = vsel %vm831_vm4, %v1081_v11, -inf }
 0x4e7   :  { %1083 = vmax.xlane.f32.xlu0 %v1082_v12 }
 0x570   :  { %v1084_v13 = vpop.xlane.xlu0 %1083 }
 0x571   :  { %v1085_v14 = vsub.f32 %v1081_v11, %v1084_v13 }
 0x573   :  { %v1086_v15 = vmul.f32 1.442695, %v1085_v14 }
 0x575   :  { %1422 = vpow2.f32 %v1086_v15 }
 0x582   :  { %v1423_v16 = vpop.eup %1422 }
 0x583   :  { %v1088_v17 = vsel %vm831_vm4, %v1423_v16, 0.0 }
 0x584   :  { %1089 = vadd.xlane.f32.xlu0 %v1088_v17 }
 0x60d   :  { %v1090_v18 = vpop.xlane.xlu0 %1089 }
 0x60e   :  { %1424 = vlog2.f32 %v1090_v18 }
 0x61b   :  { %v1425_v19 = vpop.eup %1424 }
 0x61c   :  { %v1092_v20 = vmul.f32 0.6931472, %v1425_v19 }
 0x61e   :  { %v1093_v21 = vsub.f32 %v1085_v14, %v1092_v20 }
 0x620   :  { %1094 = vst.msk [vmem:[#allocation2] sm:$0xff] %vm831_vm4, %v1093_v21 }
 0x621   :  { %1437 = shalt.err (!%p1434_p4)
}
 0x622   :  { %1104 = dma.vmem_to_hbm [thread:$0]  %s1102_s11, 128, %s1856_s13, [#allocation3]  }
 0x623   :  { %1446 = dma.done.wait [#allocation3], 128  }
 0x624   :  { %1447 = vsyncadd [#allocation3], 4294967168 }
 0x625   :  { %1108 = vsyncpa [#allocation3], 1 }

</bundles_post_ra>
